<compile_context>
chip_gen: v5e
topology: v5e:2x2
jax: 0.10.0
libtpu: 0.0.40
codegen_flags: <defaults>
</compile_context>

<pallas_src>
import jax
import jax.numpy as jnp
from jax.experimental import pallas as pl
from jax.experimental.pallas import tpu as pltpu


_TARGET_BLOCK_BYTES = 8 * 1024 * 1024        # ~8 MiB per block (amortize per-step cost)
_VMEM_LIMIT_BYTES = 48 * 1024 * 1024         # fits v7x (64 MiB) and v5e/v6e (128 MiB)
_LANE_WIDTHS = (8192, 4096, 2048, 1024, 512, 256, 128)
_FALLBACK_CHUNK_BYTES = 512 * 1024           # data bytes per block for the (1, n) fallback


def _copy_kernel(x_ref, o_ref):
    # Pure VMEM tile copy (mem-bound; no compute slot ever binds).
    o_ref[...] = x_ref[...]


def _identity_copy_pallas(x: jax.Array, *, donate: bool = False) -> jax.Array:
    """Identity materialized as a lane-dense, byte-sized-tiled Pallas copy.

    No wrapper-side pad/slice: tail blocks are handled by Pallas boundary
    masking, so HBM traffic is exactly 2 * x.nbytes.
    """
    orig_shape = x.shape
    dtype = x.dtype
    n = x.size
    if n == 0:
        return x

    itemsize = jnp.dtype(dtype).itemsize
    nbytes = n * itemsize

    # Pick the largest lane width that divides n exactly (free bitcast reshape).
    lane = next((l for l in _LANE_WIDTHS if n % l == 0), None)

    if lane is not None:
        # Lane-dense path: (rows, lane) with lane a large multiple of 128.
        rows = n // lane
        view = x.reshape(rows, lane)
        max_rows = max(8, _TARGET_BLOCK_BYTES // (lane * itemsize))
        if rows <= max_rows:
            tile_rows = rows                          # single full-extent block
        else:
            tile_rows = max(8, (max_rows // 8) * 8)   # sublane-granular tile
        grid = (pl.cdiv(rows, tile_rows),)            # last block masked if needed
        block = (tile_rows, lane)
        index_map = lambda i: (i, 0)
    else:
        # n is not a multiple of 128: no lane-dense 2-D view exists without
        # padding.  View as (1, n) and tile the lane axis in multiples of 128;
        # only the final block uses masked stores.  Chunk kept modest because a
        # 1-row block pads to 8 sublanes in VMEM.
        view = x.reshape(1, n)
        chunk = max(128, ((_FALLBACK_CHUNK_BYTES // itemsize) // 128) * 128)
        tile_cols = n if n <= chunk else chunk
        grid = (pl.cdiv(n, tile_cols),)
        block = (1, tile_cols)
        index_map = lambda j: (0, j)

    out = pl.pallas_call(
        _copy_kernel,
        out_shape=jax.ShapeDtypeStruct(view.shape, dtype),
        grid_spec=pltpu.PrefetchScalarGridSpec(
            num_scalar_prefetch=0,
            grid=grid,
            in_specs=[pl.BlockSpec(block, index_map)],
            out_specs=pl.BlockSpec(block, index_map),
        ),
        compiler_params=pltpu.CompilerParams(
            dimension_semantics=("parallel",),
            vmem_limit_bytes=_VMEM_LIMIT_BYTES,
        ),
        cost_estimate=pl.CostEstimate(
            flops=0, transcendentals=0, bytes_accessed=2 * nbytes
        ),
        input_output_aliases=({0: 0} if donate else {}),
    )(view)

    return out.reshape(orig_shape)


def identity(x: jax.Array, *, force_kernel: bool = False,
             donate: bool = False) -> jax.Array:
    """Identity forward pass.

    Default path returns x directly (zero HBM traffic — the optimal
    implementation of nn.Identity).  Set force_kernel=True to run the
    materialized Pallas copy kernel; donate=True aliases the output onto the
    input HBM buffer (input_output_aliases) to halve allocator footprint.
    """
    if not force_kernel:
        return x
    return _identity_copy_pallas(x, donate=donate)


if __name__ == "__main__":
    key = jax.random.PRNGKey(0)
    k0, k1, k2, k3 = jax.random.split(key, 4)

    # 1) NCHW input consistent with the PyTorch module's typical usage.
    #    n = 2048 -> lane-dense single-block path.
    x = jax.random.normal(k0, (2, 4, 16, 16), dtype=jnp.float32)
    y = identity(x, force_kernel=True)
    jax.block_until_ready(y)
    assert y.shape == x.shape and y.dtype == x.dtype
    assert bool(jnp.all(y == x)), "Identity (pallas copy) output mismatch"

    # 2) Non-128-aligned 1-D tensor -> (1, n) fallback path, single block.
    #    (Previously padded+sliced in the wrapper; now zero extra HBM traffic.)
    x1 = jax.random.normal(k1, (1000,), dtype=jnp.bfloat16)
    y1 = identity(x1, force_kernel=True)
    jax.block_until_ready(y1)
    assert y1.shape == x1.shape and y1.dtype == x1.dtype
    assert bool(jnp.all(y1 == x1)), "Identity (fallback, single block) mismatch"

    # 3) Non-128-aligned, multi-block fallback: exercises Pallas boundary
    #    masking on the last grid step (grid = 3, partial final block).
    x2 = jax.random.normal(k2, (600_000,), dtype=jnp.bfloat16)
    y2 = identity(x2, force_kernel=True)
    jax.block_until_ready(y2)
    assert y2.shape == x2.shape and y2.dtype == x2.dtype
    assert bool(jnp.all(y2 == x2)), "Identity (fallback, multi-block) mismatch"

    # 4) Lane-dense multi-block path with a row remainder (last block masked):
    #    rows = 2305, tile_rows = 2048 -> grid = 2.
    x3 = jax.random.normal(k3, (2305, 1024), dtype=jnp.float32)
    y3 = identity(x3, force_kernel=True)
    jax.block_until_ready(y3)
    assert y3.shape == x3.shape and y3.dtype == x3.dtype
    assert bool(jnp.all(y3 == x3)), "Identity (lane-dense, multi-block) mismatch"

    # Zero-HBM-traffic fast path (the real Identity forward).
    y_fast = identity(x)
    assert y_fast is x

    print("KERNEL_OK")
</pallas_src>

<mosaic_0001>
module attributes {stable_mosaic.version = 11 : i64} {
  func.func @_copy_kernel(%arg0: i32, %arg1: memref<1x2048xf32, #tpu.memory_space<vmem>>, %arg2: memref<1x2048xf32, #tpu.memory_space<vmem>>) attributes {dimension_semantics = [#tpu.dimension_semantics<parallel>], iteration_bounds = array<i64: 1>, scalar_prefetch = 0 : i64, scratch_operands = 0 : i64, tpu.core_type = #tpu.core_type<tc>, window_params = [{transform_indices = @transform_0, window_bounds = array<i64: 1, 2048>}, {transform_indices = @transform_1, window_bounds = array<i64: 1, 2048>}]} {
    %c0 = arith.constant 0 : index
    %c0_0 = arith.constant 0 : index
    %0 = vector.load %arg1[%c0, %c0_0] : memref<1x2048xf32, #tpu.memory_space<vmem>>, vector<1x2048xf32>
    %c0_1 = arith.constant 0 : index
    %c0_2 = arith.constant 0 : index
    %1 = vector.load %arg2[%c0_1, %c0_2] : memref<1x2048xf32, #tpu.memory_space<vmem>>, vector<1x2048xf32>
    tpu.vector_store %arg2[%c0_1, %c0_2], %0 {strides = array<i32>} : memref<1x2048xf32, #tpu.memory_space<vmem>>, vector<1x2048xf32>,
    return
  }
  func.func @transform_0(%arg0: i32) -> (i32, i32) {
    %c0_i32 = arith.constant 0 : i32
    %c0_i32_0 = arith.constant 0 : i32
    return %arg0, %c0_i32 : i32, i32
  }
  func.func @transform_1(%arg0: i32) -> (i32, i32) {
    %c0_i32 = arith.constant 0 : i32
    %c0_i32_0 = arith.constant 0 : i32
    return %arg0, %c0_i32 : i32, i32
  }
}

</mosaic_0001>

<bundles_post_ra>
// kernel: tpu_custom_call.1
= control target key start
LH: loop header
LB: loop body
LE: loop exit
PB: predicated region body
PF: predicated region fallthrough
CT: control target
= control target key end

     0   :  { %6 = vsyncpa [#allocation3], 0  ;;  %s116_s0 = inlined_call_operand.hbm [shape: f32[1,2048], index: 0, kind: input, shape index: {}]   ;;  %s117_s1 = inlined_call_operand.hbm [shape: f32[1,2048], index: 1, kind: output, shape index: {}]  }
   0x1   :  { %7 = vsyncpa [#allocation4], 0  ;;  %s13_s8 = sshll.u32 %s116_s0, 4  ;;  %s98_s9 = smov [#allocation2]   ;;  %s14_s8 = int_to_ptr.hbm [resolvable:$true] %s13_s8 }
   0x2   :  { %s15_s10 = sshll.u32 %s98_s9, 4  ;;  %s16_s10 = int_to_ptr.vmem [resolvable:$true] %s15_s10 }
   0x3   :  { %18 = dma.hbm_to_vmem [thread:$0]  %s14_s8, 256, %s16_s10, [#allocation3]  }
   0x4   :  { %94 = dma.done.wait [#allocation3], 256  }
   0x5   :  { %95 = vsyncadd [#allocation3], 4294967040  ;;  %s99_s11 = smov [#allocation5]   ;;  %s34_s15 = sshll.u32 %s117_s1, 4  ;;  %v23_v0 = vld [vmem:[#allocation2] sm:$0xff]  ;;  %v24_v1 = vld [vmem:[#allocation2 + $0x8] sm:$0xff]  ;;  %s35_s15 = int_to_ptr.hbm [resolvable:$true] %s34_s15 }
   0x6   :  { %s32_s12 = sshll.u32 %s99_s11, 4  ;;  %25 = vst [vmem:[#allocation5] sm:$0xff] %v23_v0  ;;  %s33_s12 = int_to_ptr.vmem [resolvable:$true] %s32_s12 }
   0x7   :  { %26 = vst [vmem:[#allocation5 + $0x8] sm:$0xff] %v24_v1 }
   0x8   :  { %37 = dma.vmem_to_hbm [thread:$0]  %s33_s12, 256, %s35_s15, [#allocation4]  }
   0x9   :  { %96 = dma.done.wait [#allocation4], 256  }
   0xa   :  { %97 = vsyncadd [#allocation4], 4294967040 }
   0xb   :  { %42 = vsyncpa [#allocation3], 1 }
   0xc   :  { %43 = vsyncpa [#allocation4], 1 }

</bundles_post_ra>
